<compile_context>
chip_gen: v7x
topology: tpu7x:2x2x1
jax: 0.10.0
libtpu: 0.0.40
codegen_flags: <defaults>
</compile_context>

<pallas_src>
import functools

import jax
import jax.numpy as jnp
from jax.experimental import pallas as pl
from jax.experimental.pallas import tpu as pltpu


def _round_up(x, m):
    return ((x + m - 1) // m) * m


def _pad2d(a, rows, cols):
    r, c = a.shape
    if (r, c) == (rows, cols):
        return a                      # no per-call pad op when already aligned
    return jnp.pad(a, ((0, rows - r), (0, cols - c)))


def _tpu_vmem_capacity(default_bytes=64 << 20):
    """Physical per-core VMEM; conservative default if the query fails."""
    try:
        return int(pltpu.get_tpu_info().vmem_capacity_bytes)
    except Exception:
        return default_bytes


def _ffn_resident_kernel(x_ref, w1_ref, b1_ref, w2_ref, b2_ref, o_ref):
    # Whole (padded) W1/W2/b1/b2 resident in VMEM; one row tile per grid step.
    #   x_ref:(tm, dm_p)  w1:(dm_p, df_p)  b1:(1, df_p)
    #   w2:(df_p, dm_p)   b2:(1, dm_p)     o_ref:(tm, dm_p)
    h = jnp.dot(x_ref[...], w1_ref[...], preferred_element_type=jnp.float32)
    h = jnp.maximum(h + b1_ref[...], 0.0)
    o = jnp.dot(h.astype(w2_ref.dtype), w2_ref[...],
                preferred_element_type=jnp.float32)
    o_ref[...] = (o + b2_ref[...]).astype(o_ref.dtype)


def _ffn_streamed_kernel(x_ref, w1_ref, b1_ref, w2_ref, b2_ref, o_ref, acc_ref):
    # d_ff streamed in (dm_p, tk)/(tk, dm_p) tiles along grid axis 1,
    # f32 accumulator in VMEM scratch (tiling d_ff commutes with the ReLU).
    k = pl.program_id(1)
    h = jnp.dot(x_ref[...], w1_ref[...], preferred_element_type=jnp.float32)
    h = jnp.maximum(h + b1_ref[...], 0.0)
    part = jnp.dot(h.astype(w2_ref.dtype), w2_ref[...],
                   preferred_element_type=jnp.float32)

    @pl.when(k == 0)
    def _():
        acc_ref[...] = part           # first tile: plain store, no zero-init RMW

    @pl.when(k > 0)
    def _():
        acc_ref[...] += part

    @pl.when(k == pl.num_programs(1) - 1)
    def _():
        o_ref[...] = (acc_ref[...] + b2_ref[...]).astype(o_ref.dtype)


def positionwise_ffn(x, w1, b1, w2, b2, *, tm=512, tk=1024,
                     compute_dtype=jnp.bfloat16, weights_resident=None,
                     vmem_limit_bytes=None):
    """x: [B, S, d_model] -> [B, S, d_model]   (eval-mode forward).

    w1: [d_model, d_ff], b1: [d_ff], w2: [d_ff, d_model], b2: [d_model]
    (weights stored as [in_features, out_features]).
    compute_dtype: dtype for x/W1/W2 on the MXU (default bf16; accumulation is
    always f32).  weights_resident: None = auto-choose by VMEM budget.
    """
    B, S, d_model = x.shape
    d_ff = w1.shape[1]
    M = B * S
    out_dtype = x.dtype

    if compute_dtype is not None:
        x = x.astype(compute_dtype)
        w1 = w1.astype(compute_dtype)
        w2 = w2.astype(compute_dtype)
    # Biases are added to the f32 intermediate/accumulator; keep them f32.
    b1 = b1.astype(jnp.float32)
    b2 = b2.astype(jnp.float32)

    isz = jnp.dtype(x.dtype).itemsize
    osz = jnp.dtype(out_dtype).itemsize

    # Lane alignment (128). NOTE: rounding to 256 matches the v6e/v7x MXU N/K
    # dim but can cost up to +33% padded bytes for awkward d_model; keep 128.
    dm_p = _round_up(d_model, 128)
    df_full = _round_up(d_ff, 128)

    # Row tile: cap at the padded row count; keep >=2 "parallel" tiles when
    # possible so both v7x TensorCores get work (no-op on v5e/v6e).
    tm = max(8, min(tm, _round_up(M, 8)))
    if M > 8 and _round_up(M, tm) // tm < 2:
        tm = _round_up((M + 1) // 2, 8)
    M_p = _round_up(M, tm)
    n_row_tiles = M_p // tm

    vmem_cap = _tpu_vmem_capacity()
    budget = (3 * vmem_cap) // 4          # headroom for Mosaic internal scratch
    headroom = 4 << 20

    def resident_vmem(tm_):
        return (2 * tm_ * dm_p * isz              # x tile (double-buffered)
                + 2 * tm_ * dm_p * osz            # out tile
                + 2 * dm_p * df_full * isz        # W1 (conservative 2x)
                + 2 * df_full * dm_p * isz        # W2
                + 2 * (df_full + dm_p) * 4        # biases (f32)
                + tm_ * df_full * (4 + isz)       # f32 h temp + cast copy
                + headroom)

    def streamed_vmem(tm_, tk_):
        return (2 * tm_ * dm_p * isz
                + 2 * tm_ * dm_p * osz
                + 2 * dm_p * tk_ * isz            # W1 tile
                + 2 * tk_ * dm_p * isz            # W2 tile
                + 2 * (tk_ + dm_p) * 4            # bias tiles
                + tm_ * dm_p * 4                  # f32 accumulator scratch
                + tm_ * tk_ * (4 + isz)           # f32 h temp + cast copy
                + headroom)

    def scoped_limit(estimate):
        if vmem_limit_bytes is not None:
            return int(vmem_limit_bytes)
        return int(min(max(estimate, 16 << 20), (vmem_cap * 9) // 10))

    if weights_resident is None:
        weights_resident = resident_vmem(tm) <= budget

    total_flops = 2 * M * d_model * d_ff * 2       # both matmuls
    x2d = x.reshape(M, d_model)

    if weights_resident:
        x_p = _pad2d(x2d, M_p, dm_p)
        w1_p = _pad2d(w1, dm_p, df_full)
        b1_p = _pad2d(b1.reshape(1, d_ff), 1, df_full)
        w2_p = _pad2d(w2, df_full, dm_p)
        b2_p = _pad2d(b2.reshape(1, d_model), 1, dm_p)

        cost = pl.CostEstimate(
            flops=total_flops, transcendentals=0,
            bytes_accessed=(M * d_model * isz + M * d_model * osz
                            + 2 * d_model * d_ff * isz      # weights once
                            + (d_ff + d_model) * 4))

        out2d = pl.pallas_call(
            _ffn_resident_kernel,
            out_shape=jax.ShapeDtypeStruct((M_p, dm_p), out_dtype),
            grid_spec=pltpu.PrefetchScalarGridSpec(
                num_scalar_prefetch=0,
                grid=(n_row_tiles,),
                in_specs=[
                    pl.BlockSpec((tm, dm_p), lambda i: (i, 0)),        # x rows
                    pl.BlockSpec((dm_p, df_full), lambda i: (0, 0)),   # W1
                    pl.BlockSpec((1, df_full), lambda i: (0, 0)),      # b1
                    pl.BlockSpec((df_full, dm_p), lambda i: (0, 0)),   # W2
                    pl.BlockSpec((1, dm_p), lambda i: (0, 0)),         # b2
                ],
                out_specs=pl.BlockSpec((tm, dm_p), lambda i: (i, 0)),
            ),
            compiler_params=pltpu.CompilerParams(
                dimension_semantics=("parallel",),
                vmem_limit_bytes=scoped_limit(resident_vmem(tm)),
            ),
            cost_estimate=cost,
        )(x_p, w1_p, b1_p, w2_p, b2_p)

    else:
        # Streamed d_ff path. Shrink tk / tm if the tiles overflow the budget.
        tk = _round_up(max(128, min(tk, df_full)), 128)
        while streamed_vmem(tm, tk) > budget and tk > 128:
            tk = max(128, _round_up(tk // 2, 128))
        while streamed_vmem(tm, tk) > budget and tm > 128:
            tm = max(128, _round_up(tm // 2, 8))
        M_p = _round_up(M, tm)
        n_row_tiles = M_p // tm
        df_p = _round_up(d_ff, tk)

        x_p = _pad2d(x2d, M_p, dm_p)
        w1_p = _pad2d(w1, dm_p, df_p)
        b1_p = _pad2d(b1.reshape(1, d_ff), 1, df_p)
        w2_p = _pad2d(w2, df_p, dm_p)
        b2_p = _pad2d(b2.reshape(1, d_model), 1, dm_p)

        cost = pl.CostEstimate(
            flops=total_flops, transcendentals=0,
            bytes_accessed=(M * d_model * isz + M * d_model * osz
                            + n_row_tiles * 2 * d_model * d_ff * isz  # weights
                            + n_row_tiles * (d_ff + d_model) * 4))    # biases

        # TODO(synk): if weight DMA is still exposed after bf16 + large tm,
        # set pipeline_mode=pl.Buffered(3) on the W1/W2 specs only.
        out2d = pl.pallas_call(
            _ffn_streamed_kernel,
            out_shape=jax.ShapeDtypeStruct((M_p, dm_p), out_dtype),
            grid_spec=pltpu.PrefetchScalarGridSpec(
                num_scalar_prefetch=0,
                grid=(n_row_tiles, df_p // tk),
                in_specs=[
                    pl.BlockSpec((tm, dm_p), lambda i, k: (i, 0)),   # x rows
                    pl.BlockSpec((dm_p, tk), lambda i, k: (0, k)),   # W1 tile
                    pl.BlockSpec((1, tk),    lambda i, k: (0, k)),   # b1 tile
                    pl.BlockSpec((tk, dm_p), lambda i, k: (k, 0)),   # W2 tile
                    pl.BlockSpec((1, dm_p),  lambda i, k: (0, 0)),   # b2
                ],
                out_specs=pl.BlockSpec((tm, dm_p), lambda i, k: (i, 0)),
                scratch_shapes=[pltpu.VMEM((tm, dm_p), jnp.float32)],
            ),
            compiler_params=pltpu.CompilerParams(
                dimension_semantics=("parallel", "arbitrary"),
                vmem_limit_bytes=scoped_limit(streamed_vmem(tm, tk)),
            ),
            cost_estimate=cost,
        )(x_p, w1_p, b1_p, w2_p, b2_p)

    return out2d[:M, :d_model].reshape(B, S, d_model)


def init_params(key, d_model, d_ff, dtype=jnp.float32):
    """Deterministic init mimicking nn.Linear (uniform +/- 1/sqrt(fan_in))."""
    k1, k2, k3, k4 = jax.random.split(key, 4)
    lim1 = 1.0 / (d_model ** 0.5)
    lim2 = 1.0 / (d_ff ** 0.5)
    # Stored as [in_features, out_features] so the kernel does x @ W directly.
    w1 = jax.random.uniform(k1, (d_model, d_ff), dtype, -lim1, lim1)
    b1 = jax.random.uniform(k2, (d_ff,), dtype, -lim1, lim1)
    w2 = jax.random.uniform(k3, (d_ff, d_model), dtype, -lim2, lim2)
    b2 = jax.random.uniform(k4, (d_model,), dtype, -lim2, lim2)
    return w1, b1, w2, b2


if __name__ == "__main__":
    key = jax.random.PRNGKey(0)
    kx, kp = jax.random.split(key)

    # Small, oddly-sized shapes to exercise row/lane padding and both the
    # weights-resident and d_ff-streamed paths (M = 2*7 = 14 rows).
    B, S, d_model, d_ff = 2, 7, 32, 256
    x = jax.random.normal(kx, (B, S, d_model), jnp.float32)
    w1, b1, w2, b2 = init_params(kp, d_model, d_ff)

    # Reference in plain JAX (eval-mode dropout == identity).
    ref = jnp.maximum(x.reshape(-1, d_model) @ w1 + b1, 0.0) @ w2 + b2
    ref = ref.reshape(B, S, d_model)

    # 1) f32 compute, weights-resident fast path -> tight tolerance.
    ffn_res = jax.jit(functools.partial(
        positionwise_ffn, compute_dtype=None, weights_resident=True))
    out_res = jax.block_until_ready(ffn_res(x, w1, b1, w2, b2))
    assert out_res.shape == (B, S, d_model)
    assert jnp.allclose(out_res, ref, atol=1e-5, rtol=1e-5), (
        float(jnp.max(jnp.abs(out_res - ref))))

    # 2) f32 compute, streamed d_ff path (2 accumulation steps with tk=128).
    ffn_str = jax.jit(functools.partial(
        positionwise_ffn, compute_dtype=None, weights_resident=False, tk=128))
    out_str = jax.block_until_ready(ffn_str(x, w1, b1, w2, b2))
    assert jnp.allclose(out_str, ref, atol=1e-5, rtol=1e-5), (
        float(jnp.max(jnp.abs(out_str - ref))))

    # 3) default bf16 MXU path (f32 accumulation) -> loose tolerance vs f32.
    ffn_bf16 = jax.jit(positionwise_ffn)
    out_bf16 = jax.block_until_ready(ffn_bf16(x, w1, b1, w2, b2))
    assert jnp.allclose(out_bf16, ref, atol=5e-2, rtol=5e-2), (
        float(jnp.max(jnp.abs(out_bf16 - ref))))

    print("KERNEL_OK")
</pallas_src>

<mosaic_0001>
module attributes {stable_mosaic.version = 11 : i64} {
  func.func @_ffn_resident_kernel(%arg0: i32, %arg1: memref<8x128xf32, #tpu.memory_space<vmem>>, %arg2: memref<128x256xf32, #tpu.memory_space<vmem>>, %arg3: memref<1x256xf32, #tpu.memory_space<vmem>>, %arg4: memref<256x128xf32, #tpu.memory_space<vmem>>, %arg5: memref<1x128xf32, #tpu.memory_space<vmem>>, %arg6: memref<8x128xf32, #tpu.memory_space<vmem>>) attributes {dimension_semantics = [#tpu.dimension_semantics<parallel>], iteration_bounds = array<i64: 2>, scalar_prefetch = 0 : i64, scratch_operands = 0 : i64, tpu.core_type = #tpu.core_type<tc>, window_params = [{transform_indices = @transform_0, window_bounds = array<i64: 8, 128>}, {pipeline_mode = #tpu.pipeline_mode<synchronous>, transform_indices = @transform_1, window_bounds = array<i64: 128, 256>}, {pipeline_mode = #tpu.pipeline_mode<synchronous>, transform_indices = @transform_2, window_bounds = array<i64: 1, 256>}, {pipeline_mode = #tpu.pipeline_mode<synchronous>, transform_indices = @transform_3, window_bounds = array<i64: 256, 128>}, {pipeline_mode = #tpu.pipeline_mode<synchronous>, transform_indices = @transform_4, window_bounds = array<i64: 1, 128>}, {transform_indices = @transform_5, window_bounds = array<i64: 8, 128>}]} {
    %c0 = arith.constant 0 : index
    %c0_0 = arith.constant 0 : index
    %0 = vector.load %arg1[%c0, %c0_0] : memref<8x128xf32, #tpu.memory_space<vmem>>, vector<8x128xf32>
    %c0_1 = arith.constant 0 : index
    %c0_2 = arith.constant 0 : index
    %1 = vector.load %arg2[%c0_1, %c0_2] : memref<128x256xf32, #tpu.memory_space<vmem>>, vector<128x256xf32>
    %cst = arith.constant dense<0.000000e+00> : vector<8x256xf32>
    %2 = tpu.matmul %0, %1, %cst {dimension_numbers = #tpu.dot_dimension_numbers<[1], [0], [0], [1], [0, 0, 1, 1], [], []>} : vector<8x128xf32>, vector<128x256xf32>, vector<8x256xf32> -> vector<8x256xf32>
    %c0_3 = arith.constant 0 : index
    %c0_4 = arith.constant 0 : index
    %3 = vector.load %arg3[%c0_3, %c0_4] : memref<1x256xf32, #tpu.memory_space<vmem>>, vector<1x256xf32>
    %4 = vector.broadcast %3 : vector<1x256xf32> to vector<8x256xf32>
    %5 = arith.addf %2, %4 : vector<8x256xf32>
    %cst_5 = arith.constant 0.000000e+00 : f32
    %6 = vector.broadcast %cst_5 : f32 to vector<8x256xf32>
    %7 = arith.maximumf %5, %6 : vector<8x256xf32>
    %c0_6 = arith.constant 0 : index
    %c0_7 = arith.constant 0 : index
    %8 = vector.load %arg4[%c0_6, %c0_7] : memref<256x128xf32, #tpu.memory_space<vmem>>, vector<256x128xf32>
    %cst_8 = arith.constant dense<0.000000e+00> : vector<8x128xf32>
    %9 = tpu.matmul %7, %8, %cst_8 {dimension_numbers = #tpu.dot_dimension_numbers<[1], [0], [0], [1], [0, 0, 1, 1], [], []>} : vector<8x256xf32>, vector<256x128xf32>, vector<8x128xf32> -> vector<8x128xf32>
    %c0_9 = arith.constant 0 : index
    %c0_10 = arith.constant 0 : index
    %10 = vector.load %arg5[%c0_9, %c0_10] : memref<1x128xf32, #tpu.memory_space<vmem>>, vector<1x128xf32>
    %11 = vector.broadcast %10 : vector<1x128xf32> to vector<8x128xf32>
    %12 = arith.addf %9, %11 : vector<8x128xf32>
    %c0_11 = arith.constant 0 : index
    %c0_12 = arith.constant 0 : index
    %13 = vector.load %arg6[%c0_11, %c0_12] : memref<8x128xf32, #tpu.memory_space<vmem>>, vector<8x128xf32>
    tpu.vector_store %arg6[%c0_11, %c0_12], %12 {strides = array<i32>} : memref<8x128xf32, #tpu.memory_space<vmem>>, vector<8x128xf32>,
    return
  }
  func.func @transform_0(%arg0: i32) -> (i32, i32) {
    %c0_i32 = arith.constant 0 : i32
    %c0_i32_0 = arith.constant 0 : i32
    return %arg0, %c0_i32 : i32, i32
  }
  func.func @transform_1(%arg0: i32) -> (i32, i32) {
    %c0_i32 = arith.constant 0 : i32
    %c0_i32_0 = arith.constant 0 : i32
    %c0_i32_1 = arith.constant 0 : i32
    return %c0_i32, %c0_i32_0 : i32, i32
  }
  func.func @transform_2(%arg0: i32) -> (i32, i32) {
    %c0_i32 = arith.constant 0 : i32
    %c0_i32_0 = arith.constant 0 : i32
    %c0_i32_1 = arith.constant 0 : i32
    return %c0_i32, %c0_i32_0 : i32, i32
  }
  func.func @transform_3(%arg0: i32) -> (i32, i32) {
    %c0_i32 = arith.constant 0 : i32
    %c0_i32_0 = arith.constant 0 : i32
    %c0_i32_1 = arith.constant 0 : i32
    return %c0_i32, %c0_i32_0 : i32, i32
  }
  func.func @transform_4(%arg0: i32) -> (i32, i32) {
    %c0_i32 = arith.constant 0 : i32
    %c0_i32_0 = arith.constant 0 : i32
    %c0_i32_1 = arith.constant 0 : i32
    return %c0_i32, %c0_i32_0 : i32, i32
  }
  func.func @transform_5(%arg0: i32) -> (i32, i32) {
    %c0_i32 = arith.constant 0 : i32
    %c0_i32_0 = arith.constant 0 : i32
    return %arg0, %c0_i32 : i32, i32
  }
}

</mosaic_0001>

<bundles_post_ra>
// kernel: positionwise_ffn.1
= control target key start
LH: loop header
LB: loop body
LE: loop exit
PB: predicated region body
PF: predicated region fallthrough
CT: control target
= control target key end

     0   :  { %s658_s18 = smov 0   ;;  %s890_s0 = inlined_call_operand.vmem [shape: f32[16,128], index: 0, kind: input, shape index: {}]   ;;  %s891_s1 = inlined_call_operand.vmem [shape: f32[128,256], index: 1, kind: input, shape index: {}]   ;;  %s892_s2 = inlined_call_operand.vmem [shape: f32[1,256], index: 2, kind: input, shape index: {}]   ;;  %s893_s3 = inlined_call_operand.vmem [shape: f32[256,128], index: 3, kind: input, shape index: {}]   ;;  %s894_s4 = inlined_call_operand.vmem [shape: f32[1,128], index: 4, kind: input, shape index: {}]   ;;  %s895_s5 = inlined_call_operand.vmem [shape: f32[16,128], index: 5, kind: output, shape index: {}]  }
   0x1 LB: > { %s501_s19 = sadd.s32 4294967295, %s625_s18   ;;  %p505_p0 = scmp.ge.s32.totalorder %s625_s18, 1  ;;  %s625_s18 = sphi %s658_s18, %s15_s18  }
   0x2   : > { %p186_p1 = scmp.lt.s32.totalorder %s625_s18, 3 }
   0x4   : > { %p187_p2 = pnand %p505_p0, %p186_p1 }
   0x5   : > { %v222_v0 = vld [vmem:[%s891_s1 + $0x8] sm:$0xff] (!%p187_p2)  ;;  %v224_v1 = vld [vmem:[%s891_s1 + $0x18] sm:$0xff] (!%p187_p2)  ;;  %v221_v2 = vld [vmem:[%s891_s1] sm:$0xff] (!%p187_p2)  ;;  %v627_v7 = vmov (!%p187_p2), 0.0   ;;  %p788_p3 = scmp.lt.s32.totalorder (!%p187_p2), %s501_s19, 1 }
   0x6   : > { %190 = sbr.rel (%p187_p2) target bundleno = 476 (0x1dc), region = 40  ;;  %v546_v3 = vpack.c.bf16 (!%p187_p2), %v224_v1, %v222_v0  ;;  %v223_v4 = vld [vmem:[%s891_s1 + $0x10] sm:$0xff] (!%p187_p2)  ;;  %v226_v5 = vld [vmem:[%s891_s1 + $0x28] sm:$0xff] (!%p187_p2)  ;;  %v228_v6 = vld [vmem:[%s891_s1 + $0x38] sm:$0xff] (!%p187_p2)  ;;  %329 = vmatprep.mubr.f32.mxu0 (!%p187_p2), %v627_v7 }
   0x7   : > { %v548_v8 = vpack.c.bf16 (!%p187_p2), %v223_v4, %v221_v2  ;;  %v550_v9 = vpack.c.bf16 (!%p187_p2), %v228_v6, %v226_v5  ;;  %v225_v10 = vld [vmem:[%s891_s1 + $0x20] sm:$0xff] (!%p187_p2)  ;;  %v227_v11 = vld [vmem:[%s891_s1 + $0x30] sm:$0xff] (!%p187_p2)  ;;  %v230_v12 = vld [vmem:[%s891_s1 + $0x48] sm:$0xff] (!%p187_p2) }
   0x8   : > { %547 = vmatprep.subr.bf16.mxu0 (!%p187_p2), %v546_v3  ;;  %v232_v13 = vld [vmem:[%s891_s1 + $0x58] sm:$0xff] (!%p187_p2)  ;;  %v552_v14 = vpack.c.bf16 (!%p187_p2), %v227_v11, %v225_v10  ;;  %v229_v16 = vld [vmem:[%s891_s1 + $0x40] sm:$0xff] (!%p187_p2)  ;;  %v231_v17 = vld [vmem:[%s891_s1 + $0x50] sm:$0xff] (!%p187_p2) }
   0x9   : > { %549 = vmatpush1.bf16.msra.mxu0 (!%p187_p2), %v548_v8  ;;  %v554_v15 = vpack.c.bf16 (!%p187_p2), %v232_v13, %v230_v12  ;;  %v234_v18 = vld [vmem:[%s891_s1 + $0x68] sm:$0xff] (!%p187_p2)  ;;  %v236_v19 = vld [vmem:[%s891_s1 + $0x78] sm:$0xff] (!%p187_p2)  ;;  %v556_v20 = vpack.c.bf16 (!%p187_p2), %v231_v17, %v229_v16  ;;  %v233_v22 = vld [vmem:[%s891_s1 + $0x60] sm:$0xff] (!%p187_p2) }
   0xa   : > { %551 = vmatprep.subr.bf16.mxu0 (!%p187_p2), %v550_v9  ;;  %v558_v21 = vpack.c.bf16 (!%p187_p2), %v236_v19, %v234_v18  ;;  %v235_v23 = vld [vmem:[%s891_s1 + $0x70] sm:$0xff] (!%p187_p2)  ;;  %v238_v24 = vld [vmem:[%s891_s1 + $0x88] sm:$0xff] (!%p187_p2)  ;;  %v240_v25 = vld [vmem:[%s891_s1 + $0x98] sm:$0xff] (!%p187_p2) }
   0xb   : > { %v237_v26 = vld [vmem:[%s891_s1 + $0x80] sm:$0xff] (!%p187_p2)  ;;  %v239_v27 = vld [vmem:[%s891_s1 + $0x90] sm:$0xff] (!%p187_p2)  ;;  %v355_v29 = vld [vmem:[%s893_s3 + $0x88] sm:$0xff] (!%p187_p2)  ;;  %v560_v31 = vpack.c.bf16 (!%p187_p2), %v235_v23, %v233_v22  ;;  %v562_v36 = vpack.c.bf16 (!%p187_p2), %v240_v25, %v238_v24 }
   0xc   : > { %v354_v28 = vld [vmem:[%s893_s3 + $0x80] sm:$0xff] (!%p187_p2)  ;;  %v339_v33 = vld [vmem:[%s893_s3 + $0x8] sm:$0xff] (!%p187_p2)  ;;  %v356_v34 = vld [vmem:[%s893_s3 + $0x90] sm:$0xff] (!%p187_p2)  ;;  %v564_v46 = vpack.c.bf16 (!%p187_p2), %v239_v27, %v237_v26 }
   0xd   : > { %553 = vmatpush1.bf16.msra.mxu0 %v552_v14  ;;  %v338_v30 = vld [vmem:[%s893_s3] sm:$0xff]  ;;  %v578_v32 = vpack.c.bf16 %v355_v29, %v354_v28  ;;  %v357_v35 = vld [vmem:[%s893_s3 + $0x98] sm:$0xff]  ;;  %v340_v39 = vld [vmem:[%s893_s3 + $0x10] sm:$0xff]  ;;  %s898_s19 = smov (!%p788_p3, %s501_s19), 1 }
   0xe   : > { %555 = vmatprep.subr.bf16.mxu0 %v554_v15  ;;  %v580_v37 = vpack.c.bf16 %v339_v33, %v338_v30  ;;  %v582_v38 = vpack.c.bf16 %v357_v35, %v356_v34  ;;  %v341_v40 = vld [vmem:[%s893_s3 + $0x18] sm:$0xff]  ;;  %v358_v41 = vld [vmem:[%s893_s3 + $0xa0] sm:$0xff]  ;;  %v242_v42 = vld [vmem:[%s891_s1 + $0xa8] sm:$0xff]  ;;  %s506_s12 = sshll.u32 %s898_s19, 3  ;;  %v255_v34 = vlaneseq }
   0xf   : > { %v244_v43 = vld [vmem:[%s891_s1 + $0xb8] sm:$0xff]  ;;  %579 = vmatprep.subr.bf16.mxu1 %v578_v32  ;;  %v359_v44 = vld [vmem:[%s893_s3 + $0xa8] sm:$0xff]  ;;  %v584_v45 = vpack.c.bf16 %v341_v40, %v340_v39  ;;  %v241_v47 = vld [vmem:[%s891_s1 + $0xa0] sm:$0xff]  ;;  %s215_s21 = scalar_lea.vmem %s890_s0, %s506_s12  ;;  %s219_s22 = scalar_lea.vmem %s895_s5, %s506_s12 }
  0x10   : > { %581 = vmatpush3.bf16.msra.mxu1 %v580_v37  ;;  %v586_v48 = vpack.c.bf16 %v359_v44, %v358_v41  ;;  %v342_v49 = vld [vmem:[%s893_s3 + $0x20] sm:$0xff]  ;;  %v343_v50 = vld [vmem:[%s893_s3 + $0x28] sm:$0xff]  ;;  %v566_v51 = vpack.c.bf16 %v244_v43, %v242_v42  ;;  %v243_v52 = vld [vmem:[%s891_s1 + $0xb0] sm:$0xff]  ;;  %v256_v35 = vshrl.u32 %v255_v34, 7 }
  0x11   : > { %557 = vmatpush1.bf16.msra.mxu0 %v556_v20  ;;  %583 = vmatprep.subr.bf16.mxu1 %v582_v38  ;;  %v360_v53 = vld [vmem:[%s893_s3 + $0xb0] sm:$0xff]  ;;  %v361_v54 = vld [vmem:[%s893_s3 + $0xb8] sm:$0xff]  ;;  %v246_v55 = vld [vmem:[%s891_s1 + $0xc8] sm:$0xff]  ;;  %v588_v57 = vpack.c.bf16 %v343_v50, %v342_v49  ;;  %v568_v58 = vpack.c.bf16 %v243_v52, %v241_v47 }
  0x12   : > { %559 = vmatprep.subr.bf16.mxu0 %v558_v21  ;;  %v248_v56 = vld [vmem:[%s891_s1 + $0xd8] sm:$0xff]  ;;  %v245_v59 = vld [vmem:[%s891_s1 + $0xc0] sm:$0xff]  ;;  %v590_v60 = vpack.c.bf16 %v361_v54, %v360_v53  ;;  %v344_v61 = vld [vmem:[%s893_s3 + $0x30] sm:$0xff]  ;;  %v261_v38 = vsub.s32 1, %v256_v35 }
  0x13   : > { %v345_v62 = vld [vmem:[%s893_s3 + $0x38] sm:$0xff]  ;;  %v570_v63 = vpack.c.bf16 %v248_v56, %v246_v55  ;;  %v247_v0 = vld [vmem:[%s891_s1 + $0xd0] sm:$0xff]  ;;  %v362_v1 = vld [vmem:[%s893_s3 + $0xc0] sm:$0xff] }
  0x14   : > { %585 = vmatpush3.bf16.msra.mxu1 %v584_v45  ;;  %v363_v2 = vld [vmem:[%s893_s3 + $0xc8] sm:$0xff]  ;;  %v252_v4 = vld [vmem:[%s891_s1 + $0xf8] sm:$0xff]  ;;  %v592_v5 = vpack.c.bf16 %v345_v62, %v344_v61  ;;  %v572_v6 = vpack.c.bf16 %v247_v0, %v245_v59  ;;  %v249_v7 = vld [vmem:[%s891_s1 + $0xe0] sm:$0xff] }
  0x15   : > { %561 = vmatpush1.bf16.msra.mxu0 %v560_v31  ;;  %587 = vmatprep.subr.bf16.mxu1 %v586_v48  ;;  %v250_v3 = vld [vmem:[%s891_s1 + $0xe8] sm:$0xff]  ;;  %v594_v8 = vpack.c.bf16 %v363_v2, %v362_v1  ;;  %v346_v9 = vld [vmem:[%s893_s3 + $0x40] sm:$0xff]  ;;  %v251_v12 = vld [vmem:[%s891_s1 + $0xf0] sm:$0xff] }
  0x16   : > { %563 = vmatprep.subr.bf16.mxu0 %v562_v36  ;;  %v347_v10 = vld [vmem:[%s893_s3 + $0x48] sm:$0xff]  ;;  %v574_v11 = vpack.c.bf16 %v252_v4, %v250_v3  ;;  %v364_v13 = vld [vmem:[%s893_s3 + $0xd0] sm:$0xff]  ;;  %v365_v14 = vld [vmem:[%s893_s3 + $0xd8] sm:$0xff]  ;;  %v576_v16 = vpack.c.bf16 %v251_v12, %v249_v7  ;;  %v257_v36 = vsub.s32 0, %v256_v35 }
  0x17   : > { %v596_v15 = vpack.c.bf16 %v347_v10, %v346_v9  ;;  %v598_v17 = vpack.c.bf16 %v365_v14, %v364_v13  ;;  %v348_v18 = vld [vmem:[%s893_s3 + $0x50] sm:$0xff]  ;;  %v349_v19 = vld [vmem:[%s893_s3 + $0x58] sm:$0xff]  ;;  %v366_v20 = vld [vmem:[%s893_s3 + $0xe0] sm:$0xff] }
  0x18   : > { %589 = vmatpush3.bf16.msra.mxu1 %v588_v57  ;;  %v367_v21 = vld [vmem:[%s893_s3 + $0xe8] sm:$0xff]  ;;  %v600_v22 = vpack.c.bf16 %v349_v19, %v348_v18  ;;  %v220_v23 = vld [vmem:[%s215_s21] sm:$0xff]  ;;  %v368_v28 = vld [vmem:[%s893_s3 + $0xf0] sm:$0xff] }
  0x19   : > { %565 = vmatpush1.bf16.msra.mxu0 %v564_v46  ;;  %591 = vmatprep.subr.bf16.mxu1 %v590_v60  ;;  %v602_v24 = vpack.c.bf16 %v367_v21, %v366_v20  ;;  %v350_v25 = vld [vmem:[%s893_s3 + $0x60] sm:$0xff]  ;;  %v351_v26 = vld [vmem:[%s893_s3 + $0x68] sm:$0xff]  ;;  %v369_v29 = vld [vmem:[%s893_s3 + $0xf8] sm:$0xff] }
  0x1a   : > { %567 = vmatprep.subr.bf16.mxu0 %v566_v51  ;;  %v604_v27 = vpack.c.bf16 %v351_v26, %v350_v25  ;;  %v606_v30 = vpack.c.bf16 %v369_v29, %v368_v28  ;;  %v352_v31 = vld [vmem:[%s893_s3 + $0x70] sm:$0xff]  ;;  %v353_v32 = vld [vmem:[%s893_s3 + $0x78] sm:$0xff]  ;;  %v253_v37 = vld [vmem:[%s892_s2] sm:$0x3] }
  0x1b   : > { %v608_v33 = vpack.c.bf16 %v353_v32, %v352_v31  ;;  %v258_v39 = vrot.slane %v253_v37, %v257_v36  ;;  %v262_v40 = vrot.slane %v253_v37, %v261_v38  ;;  %v508_v48 = vld [vmem:[%s894_s4] ss:$0 sm:$0xff] }
  0x1c   : > { %593 = vmatpush3.bf16.msra.mxu1 %v592_v5 }
  0x1d   : > { %569 = vmatpush1.bf16.msra.mxu0 %v568_v58  ;;  %595 = vmatprep.subr.bf16.mxu1 %v594_v8 }
  0x1e   : > { %571 = vmatprep.subr.bf16.mxu0 %v570_v63 }
  0x20   : > { %597 = vmatpush3.bf16.msra.mxu1 %v596_v15 }
  0x21   : > { %573 = vmatpush1.bf16.msra.mxu0 %v572_v6  ;;  %599 = vmatprep.subr.bf16.mxu1 %v598_v17 }
  0x22   : > { %575 = vmatprep.subr.bf16.mxu0 %v574_v11 }
  0x24   : > { %601 = vmatpush3.bf16.msra.mxu1 %v600_v22 }
  0x25   : > { %577 = vmatpush1.bf16.msra.mxu0 %v576_v16  ;;  %603 = vmatprep.subr.bf16.mxu1 %v602_v24 }
  0x28   : > { %330 = vmatmul.mubr.f32.vlgmr.msra.gmra.mrb[0].mxu0 %v220_v23  ;;  %605 = vmatpush3.bf16.msra.mxu1 %v604_v27 }
  0x29   : > { %607 = vmatprep.subr.bf16.mxu1 %v606_v30 }
  0x2c   : > { %609 = vmatpush3.bf16.msra.mxu1 %v608_v33 }
  0xfb   : > { %v331_v41 = vpop.f32.mrb[0].mxu0 }
  0xfc   : > { %v332_v42 = vadd.f32 %v331_v41, %v258_v39  ;;  %v333_v43 = vpop.f32.mrb[1].mxu0 }
  0xfd   : > { %v334_v44 = vadd.f32 %v333_v43, %v262_v40 }
  0xfe   : > { %v336_v46 = vmax.f32 %v332_v42, 0.0 }
  0xff   : > { %v337_v45 = vmax.f32 %v334_v44, 0.0 }
 0x101   : > { %441 = vmatprep.mubr.f32.mxu1 %v337_v45 }
 0x102   : > { %442 = vmatmul.mubr.f32.vlgmr.msra.gmra.mrb[0].mxu1 %v336_v46 }
 0x1d5   : > { %v543_v47 = vpop.f32.mrb[0].mxu1 }
 0x1d6   : > { %v544_v49 = vpop.f32.mrb[1].mxu1 }
 0x1d7   : > { %v545_v50 = vadd.f32 %v544_v49, %v543_v47 }
 0x1d9   : > { %v444_v51 = vadd.f32 %v545_v50, %v508_v48 }
 0x1db   : > { %447 = vst [vmem:[%s219_s22] sm:$0xff] %v444_v51 }
 0x1dc PF: > { %s15_s18 = sadd.s32 1, %s625_s18  }
 0x1dd   : > { %p12_p4 = scmp.ge.s32.totalorder %s15_s18, 4  }
 0x1df   :  { %14 = sbr.rel (!%p12_p4) target bundleno = 1 (0x1), region = 70 }

</bundles_post_ra>
